<compile_context>
chip_gen: v5e
topology: v5e:2x2
jax: 0.10.0
libtpu: 0.0.40
codegen_flags: <defaults>
</compile_context>

<pallas_src>
import functools

import jax
import jax.numpy as jnp
from jax.experimental import pallas as pl
from jax.experimental.pallas import tpu as pltpu

BN_EPS = 1e-5
LANE = 128


def _round_up(n, m):
    return (n + m - 1) // m * m


def _urnet_flat_kernel(K, L, pad_l, inv_n, mm_dtype,
                       x_ref, w1_ref, w2_ref, g1_ref, bt1_ref, g2_ref, bt2_ref,
                       o_ref, sum1, ssq1, sum2, ssq2):
    """Grid = (phase, batch-tile), iterated phase-major (batch fastest).

    phase 0: conv1, accumulate per-channel sum / sumsq             (BN1 stats)
    phase 1: conv1 -> BN1 -> ReLU -> conv2, accumulate sum / sumsq (BN2 stats)
    phase 2: conv1 -> BN1 -> ReLU -> conv2 -> BN2 -> ReLU -> output

    x_ref : [1, L, KCin_p]     im2col'ed, 'same'-padded input (matmul dtype)
    w1_ref: [KCin_p, Cout_p]   conv1 weight, taps folded into the contraction
    w2_ref: [K*Cout_p, Cout_p] conv2 weight, taps folded into the contraction
    g*/bt*: [1, Cout_p]        BN affine params (zero-padded channels)
    o_ref : [1, L, Cout_p]     f32 output (written only in phase 2)
    sum*/ssq*: [1, Cout_p]     f32 accumulators persisting across grid steps
    """
    phase = pl.program_id(0)
    b = pl.program_id(1)
    pad_r = K - 1 - pad_l

    @pl.when(jnp.logical_and(phase == 0, b == 0))
    def _init_stats():
        sum1[...] = jnp.zeros_like(sum1)
        ssq1[...] = jnp.zeros_like(ssq1)
        sum2[...] = jnp.zeros_like(sum2)
        ssq2[...] = jnp.zeros_like(ssq2)

    # conv1: one lane-dense MXU matmul (K taps pre-folded into the contraction
    # by the wrapper-side im2col; f32 accumulation).  The conv bias is omitted
    # on purpose: training-mode BN subtracts the batch mean, so it cancels.
    h1 = jnp.dot(x_ref[0], w1_ref[...], preferred_element_type=jnp.float32)

    @pl.when(phase == 0)
    def _bn1_stats():
        sum1[...] += jnp.sum(h1, axis=0, keepdims=True)
        ssq1[...] += jnp.sum(h1 * h1, axis=0, keepdims=True)

    @pl.when(phase > 0)
    def _phases_1_2():
        # BN1 folded to a single scale/shift pass, then ReLU (all f32 VPU math).
        # TODO(synk): one-pass E[x^2]-E[x]^2 variance; switch to a two-pass /
        # Welford phase if B*L becomes large enough for f32 cancellation to bite.
        mu1 = sum1[...] * inv_n
        var1 = ssq1[...] * inv_n - mu1 * mu1
        scale1 = g1_ref[...] * jax.lax.rsqrt(var1 + BN_EPS)
        shift1 = bt1_ref[...] - mu1 * scale1
        a1 = jnp.maximum(h1 * scale1 + shift1, 0.0)
        a1m = a1.astype(mm_dtype)                      # matmul operand dtype
        cp = a1m.shape[1]

        # conv2 ('same'): add the K-1 halo rows and im2col along lanes -- all on
        # SSA values held in vregs (no padded VMEM scratch round-trip) -- then a
        # single lane-dense matmul with contraction K*Cout_p.
        pieces = []
        if pad_l:
            pieces.append(jnp.zeros((pad_l, cp), mm_dtype))
        pieces.append(a1m)
        if pad_r:
            pieces.append(jnp.zeros((pad_r, cp), mm_dtype))
        a1p = jnp.concatenate(pieces, axis=0) if len(pieces) > 1 else a1m
        if K > 1:
            cols2 = jnp.concatenate([a1p[k:k + L, :] for k in range(K)], axis=1)
        else:
            cols2 = a1p
        h2 = jnp.dot(cols2, w2_ref[...], preferred_element_type=jnp.float32)

        @pl.when(phase == 1)
        def _bn2_stats():
            sum2[...] += jnp.sum(h2, axis=0, keepdims=True)
            ssq2[...] += jnp.sum(h2 * h2, axis=0, keepdims=True)

        @pl.when(phase == 2)
        def _emit():
            mu2 = sum2[...] * inv_n
            var2 = ssq2[...] * inv_n - mu2 * mu2
            scale2 = g2_ref[...] * jax.lax.rsqrt(var2 + BN_EPS)
            shift2 = bt2_ref[...] - mu2 * scale2
            o_ref[0] = jnp.maximum(h2 * scale2 + shift2, 0.0)


def urnet_flat_block(x, params, conv_kernel, matmul_dtype=jnp.bfloat16):
    """x: [B, Cin, L] (PyTorch NCL). Returns [B, Cout, L] (f32)."""
    K = conv_kernel
    B, Cin, L = x.shape
    Cout = params['w1'].shape[0]

    # PyTorch padding='same' (stride 1): total = K-1, left = total // 2.
    pad_total = K - 1
    pad_l = pad_total // 2
    pad_r = pad_total - pad_l

    KC = K * Cin
    KC_P = _round_up(KC, LANE)
    COUT_P = _round_up(Cout, LANE)

    # ---- im2col of the 'same'-padded input: [B, L, K*Cin], lane-padded to 128 ----
    x_lc = jnp.transpose(x, (0, 2, 1)).astype(jnp.float32)      # [B, L, Cin]
    x_pad = jnp.pad(x_lc, ((0, 0), (pad_l, pad_r), (0, 0)))     # [B, L+K-1, Cin]
    cols = jnp.concatenate([x_pad[:, k:k + L, :] for k in range(K)], axis=-1)
    cols = jnp.pad(cols, ((0, 0), (0, 0), (0, KC_P - KC))).astype(matmul_dtype)

    # ---- weight packing (PyTorch Conv1d weight is [Cout, Cin, K]) ----
    # conv1: [K*Cin, Cout] matching the im2col lane order (k-major, c-minor).
    w1p = jnp.transpose(params['w1'], (2, 1, 0)).reshape(KC, Cout)
    w1p = jnp.pad(w1p, ((0, KC_P - KC), (0, COUT_P - Cout))).astype(matmul_dtype)
    # conv2: taps folded into the contraction as well: [K*Cout_p, Cout_p].
    w2_kco = jnp.transpose(params['w2'], (2, 1, 0))              # [K, Cout, Cout]
    w2_kco = jnp.pad(w2_kco, ((0, 0), (0, COUT_P - Cout), (0, COUT_P - Cout)))
    w2p = w2_kco.reshape(K * COUT_P, COUT_P).astype(matmul_dtype)

    # BN affine params, zero-padded so padded channels stay exactly zero.
    def pad_c(v):
        return jnp.pad(v.astype(jnp.float32), (0, COUT_P - Cout))[None, :]
    g1, bt1 = pad_c(params['gamma1']), pad_c(params['beta1'])
    g2, bt2 = pad_c(params['gamma2']), pad_c(params['beta2'])
    # NOTE: conv biases b1/b2 are intentionally not passed -- a channel bias
    # before training-mode BN is mathematically a no-op.

    inv_n = 1.0 / float(B * L)
    kernel = functools.partial(_urnet_flat_kernel, K, L, pad_l, inv_n, matmul_dtype)

    grid = (3, B)   # (phase, batch-tile): conv1 stats / conv2 stats / emit
    y = pl.pallas_call(
        kernel,
        out_shape=jax.ShapeDtypeStruct((B, L, COUT_P), jnp.float32),
        grid_spec=pltpu.PrefetchScalarGridSpec(
            num_scalar_prefetch=0,
            grid=grid,
            in_specs=[
                pl.BlockSpec((1, L, KC_P), lambda p, b: (b, 0, 0)),
                pl.BlockSpec((KC_P, COUT_P), lambda p, b: (0, 0)),
                pl.BlockSpec((K * COUT_P, COUT_P), lambda p, b: (0, 0)),
                pl.BlockSpec((1, COUT_P), lambda p, b: (0, 0)),
                pl.BlockSpec((1, COUT_P), lambda p, b: (0, 0)),
                pl.BlockSpec((1, COUT_P), lambda p, b: (0, 0)),
                pl.BlockSpec((1, COUT_P), lambda p, b: (0, 0)),
            ],
            out_specs=pl.BlockSpec((1, L, COUT_P), lambda p, b: (b, 0, 0)),
            scratch_shapes=[
                pltpu.VMEM((1, COUT_P), jnp.float32),   # sum1
                pltpu.VMEM((1, COUT_P), jnp.float32),   # sumsq1
                pltpu.VMEM((1, COUT_P), jnp.float32),   # sum2
                pltpu.VMEM((1, COUT_P), jnp.float32),   # sumsq2
            ],
        ),
        compiler_params=pltpu.CompilerParams(
            # Both axes are sequential: phases depend on the accumulated BN
            # stats, and the batch axis accumulates into shared scratch.
            # TODO(synk): sharding the batch axis over v7x's two TensorCores
            # would need a cross-core reduction of the BN statistics.
            dimension_semantics=("arbitrary", "arbitrary"),
            vmem_limit_bytes=32 * 1024 * 1024,
        ),
    )(cols, w1p, w2p, g1, bt1, g2, bt2)

    return jnp.transpose(y[:, :, :Cout], (0, 2, 1))              # back to NCL


def reference(x, params, conv_kernel, matmul_dtype=jnp.float32):
    """Pure-JAX reference (lax conv + training-mode batchnorm).

    matmul_dtype=bfloat16 mirrors the kernel's bf16-operand / f32-accumulate
    matmuls so the fast path can be checked tightly.
    """
    K = conv_kernel
    pad_total = K - 1
    pad_l = pad_total // 2
    pad_r = pad_total - pad_l

    def conv(h, w, b):
        y = jax.lax.conv_general_dilated(
            h.astype(matmul_dtype), w.astype(matmul_dtype),
            window_strides=(1,), padding=[(pad_l, pad_r)],
            dimension_numbers=('NCH', 'OIH', 'NCH'),
            preferred_element_type=jnp.float32)
        return y + b[None, :, None]

    def bn(h, g, bt):
        mu = jnp.mean(h, axis=(0, 2), keepdims=True)
        var = jnp.mean((h - mu) ** 2, axis=(0, 2), keepdims=True)
        return (h - mu) / jnp.sqrt(var + BN_EPS) * g[None, :, None] + bt[None, :, None]

    h = jax.nn.relu(bn(conv(x, params['w1'], params['b1']),
                       params['gamma1'], params['beta1']))
    h = jax.nn.relu(bn(conv(h, params['w2'], params['b2']),
                       params['gamma2'], params['beta2']))
    return h


def init_params(key, input_size, channel_size, conv_kernel):
    k1, k2, k3, k4 = jax.random.split(key, 4)
    scale1 = 1.0 / (input_size * conv_kernel) ** 0.5
    scale2 = 1.0 / (channel_size * conv_kernel) ** 0.5
    return {
        'w1': jax.random.uniform(k1, (channel_size, input_size, conv_kernel),
                                 jnp.float32, -scale1, scale1),
        'b1': jax.random.uniform(k2, (channel_size,), jnp.float32, -scale1, scale1),
        'w2': jax.random.uniform(k3, (channel_size, channel_size, conv_kernel),
                                 jnp.float32, -scale2, scale2),
        'b2': jax.random.uniform(k4, (channel_size,), jnp.float32, -scale2, scale2),
        # PyTorch BatchNorm1d default init: weight=1, bias=0.
        'gamma1': jnp.ones((channel_size,), jnp.float32),
        'beta1': jnp.zeros((channel_size,), jnp.float32),
        'gamma2': jnp.ones((channel_size,), jnp.float32),
        'beta2': jnp.zeros((channel_size,), jnp.float32),
    }


if __name__ == "__main__":
    B, Cin, L = 2, 4, 16          # [batch, channels, len]
    channel_size = 8
    conv_kernel = 3

    key = jax.random.PRNGKey(0)
    kx, kp = jax.random.split(key)
    x = jax.random.normal(kx, (B, Cin, L), jnp.float32)
    params = init_params(kp, Cin, channel_size, conv_kernel)

    # Exactness of the kernel logic: f32-matmul path vs. pure-f32 reference.
    y32 = jax.block_until_ready(
        urnet_flat_block(x, params, conv_kernel, matmul_dtype=jnp.float32))
    ref32 = reference(x, params, conv_kernel)
    assert y32.shape == (B, channel_size, L)
    assert jnp.allclose(y32, ref32, atol=1e-4, rtol=1e-4), "f32 mismatch vs reference"

    # Default fast path: bf16 matmul operands (f32 accumulation / f32 BN+ReLU),
    # checked against a reference that mirrors the bf16 operand rounding.
    ybf = jax.block_until_ready(urnet_flat_block(x, params, conv_kernel))
    refbf = reference(x, params, conv_kernel, matmul_dtype=jnp.bfloat16)
    assert ybf.shape == (B, channel_size, L)
    assert jnp.allclose(ybf, refbf, atol=1e-2, rtol=1e-2), "bf16 mismatch vs bf16 reference"

    print("KERNEL_OK")
</pallas_src>

<mosaic_0001>
module attributes {stable_mosaic.version = 11 : i64} {
  func.func @_urnet_flat_kernel(%arg0: i32, %arg1: i32, %arg2: memref<1x16x128xf32, #tpu.memory_space<vmem>>, %arg3: memref<128x128xf32, #tpu.memory_space<vmem>>, %arg4: memref<384x128xf32, #tpu.memory_space<vmem>>, %arg5: memref<1x128xf32, #tpu.memory_space<vmem>>, %arg6: memref<1x128xf32, #tpu.memory_space<vmem>>, %arg7: memref<1x128xf32, #tpu.memory_space<vmem>>, %arg8: memref<1x128xf32, #tpu.memory_space<vmem>>, %arg9: memref<1x16x128xf32, #tpu.memory_space<vmem>>, %arg10: memref<1x128xf32, #tpu.memory_space<vmem>>, %arg11: memref<1x128xf32, #tpu.memory_space<vmem>>, %arg12: memref<1x128xf32, #tpu.memory_space<vmem>>, %arg13: memref<1x128xf32, #tpu.memory_space<vmem>>) attributes {dimension_semantics = [#tpu.dimension_semantics<arbitrary>, #tpu.dimension_semantics<arbitrary>], iteration_bounds = array<i64: 3, 2>, scalar_prefetch = 0 : i64, scratch_operands = 4 : i64, tpu.core_type = #tpu.core_type<tc>, window_params = [{transform_indices = @transform_0, window_bounds = array<i64: 1, 16, 128>}, {pipeline_mode = #tpu.pipeline_mode<synchronous>, transform_indices = @transform_1, window_bounds = array<i64: 128, 128>}, {pipeline_mode = #tpu.pipeline_mode<synchronous>, transform_indices = @transform_2, window_bounds = array<i64: 384, 128>}, {pipeline_mode = #tpu.pipeline_mode<synchronous>, transform_indices = @transform_3, window_bounds = array<i64: 1, 128>}, {pipeline_mode = #tpu.pipeline_mode<synchronous>, transform_indices = @transform_4, window_bounds = array<i64: 1, 128>}, {pipeline_mode = #tpu.pipeline_mode<synchronous>, transform_indices = @transform_5, window_bounds = array<i64: 1, 128>}, {pipeline_mode = #tpu.pipeline_mode<synchronous>, transform_indices = @transform_6, window_bounds = array<i64: 1, 128>}, {transform_indices = @transform_7, window_bounds = array<i64: 1, 16, 128>}]} {
    %c0_i32 = arith.constant 0 : i32
    %0 = arith.cmpi eq, %arg0, %c0_i32 : i32
    %c0_i32_0 = arith.constant 0 : i32
    %1 = arith.cmpi eq, %arg1, %c0_i32_0 : i32
    %2 = arith.andi %0, %1 : i1
    %3 = arith.extui %2 : i1 to i32
    %c0_i32_1 = arith.constant 0 : i32
    %4 = arith.cmpi ne, %3, %c0_i32_1 : i32
    scf.if %4 {
      %cst_10 = arith.constant 0.000000e+00 : f32
      %15 = vector.broadcast %cst_10 : f32 to vector<1x128xf32>
      %c0_11 = arith.constant 0 : index
      %c0_12 = arith.constant 0 : index
      %16 = vector.load %arg10[%c0_11, %c0_12] : memref<1x128xf32, #tpu.memory_space<vmem>>, vector<1x128xf32>
      tpu.vector_store %arg10[%c0_11, %c0_12], %15 {strides = array<i32>} : memref<1x128xf32, #tpu.memory_space<vmem>>, vector<1x128xf32>,
      %cst_13 = arith.constant 0.000000e+00 : f32
      %17 = vector.broadcast %cst_13 : f32 to vector<1x128xf32>
      %c0_14 = arith.constant 0 : index
      %c0_15 = arith.constant 0 : index
      %18 = vector.load %arg11[%c0_14, %c0_15] : memref<1x128xf32, #tpu.memory_space<vmem>>, vector<1x128xf32>
      tpu.vector_store %arg11[%c0_14, %c0_15], %17 {strides = array<i32>} : memref<1x128xf32, #tpu.memory_space<vmem>>, vector<1x128xf32>,
      %cst_16 = arith.constant 0.000000e+00 : f32
      %19 = vector.broadcast %cst_16 : f32 to vector<1x128xf32>
      %c0_17 = arith.constant 0 : index
      %c0_18 = arith.constant 0 : index
      %20 = vector.load %arg12[%c0_17, %c0_18] : memref<1x128xf32, #tpu.memory_space<vmem>>, vector<1x128xf32>
      tpu.vector_store %arg12[%c0_17, %c0_18], %19 {strides = array<i32>} : memref<1x128xf32, #tpu.memory_space<vmem>>, vector<1x128xf32>,
      %cst_19 = arith.constant 0.000000e+00 : f32
      %21 = vector.broadcast %cst_19 : f32 to vector<1x128xf32>
      %c0_20 = arith.constant 0 : index
      %c0_21 = arith.constant 0 : index
      %22 = vector.load %arg13[%c0_20, %c0_21] : memref<1x128xf32, #tpu.memory_space<vmem>>, vector<1x128xf32>
      tpu.vector_store %arg13[%c0_20, %c0_21], %21 {strides = array<i32>} : memref<1x128xf32, #tpu.memory_space<vmem>>, vector<1x128xf32>,
    } else {
    }
    %c0 = arith.constant 0 : index
    %c0_2 = arith.constant 0 : index
    %c0_3 = arith.constant 0 : index
    %5 = vector.load %arg2[%c0, %c0_2, %c0_3] : memref<1x16x128xf32, #tpu.memory_space<vmem>>, vector<1x16x128xf32>
    %6 = vector.shape_cast %5 : vector<1x16x128xf32> to vector<16x128xf32>
    %c0_4 = arith.constant 0 : index
    %c0_5 = arith.constant 0 : index
    %7 = vector.load %arg3[%c0_4, %c0_5] : memref<128x128xf32, #tpu.memory_space<vmem>>, vector<128x128xf32>
    %cst = arith.constant dense<0.000000e+00> : vector<16x128xf32>
    %8 = tpu.matmul %6, %7, %cst {dimension_numbers = #tpu.dot_dimension_numbers<[1], [0], [0], [1], [0, 0, 1, 1], [], []>} : vector<16x128xf32>, vector<128x128xf32>, vector<16x128xf32> -> vector<16x128xf32>
    %c0_i32_6 = arith.constant 0 : i32
    %9 = arith.cmpi eq, %arg0, %c0_i32_6 : i32
    %10 = arith.extui %9 : i1 to i32
    %c0_i32_7 = arith.constant 0 : i32
    %11 = arith.cmpi ne, %10, %c0_i32_7 : i32
    scf.if %11 {
      %c0_10 = arith.constant 0 : index
      %c0_11 = arith.constant 0 : index
      %15 = vector.load %arg10[%c0_10, %c0_11] : memref<1x128xf32, #tpu.memory_space<vmem>>, vector<1x128xf32>
      %cst_12 = arith.constant dense<0.000000e+00> : vector<128xf32>
      %16 = vector.multi_reduction <add>, %8, %cst_12 [0] : vector<16x128xf32> to vector<128xf32>
      %17 = vector.shape_cast %16 : vector<128xf32> to vector<1x128xf32>
      %18 = arith.addf %15, %17 : vector<1x128xf32>
      %c0_13 = arith.constant 0 : index
      %c0_14 = arith.constant 0 : index
      %19 = vector.load %arg10[%c0_13, %c0_14] : memref<1x128xf32, #tpu.memory_space<vmem>>, vector<1x128xf32>
      tpu.vector_store %arg10[%c0_13, %c0_14], %18 {strides = array<i32>} : memref<1x128xf32, #tpu.memory_space<vmem>>, vector<1x128xf32>,
      %c0_15 = arith.constant 0 : index
      %c0_16 = arith.constant 0 : index
      %20 = vector.load %arg11[%c0_15, %c0_16] : memref<1x128xf32, #tpu.memory_space<vmem>>, vector<1x128xf32>
      %21 = arith.mulf %8, %8 : vector<16x128xf32>
      %cst_17 = arith.constant dense<0.000000e+00> : vector<128xf32>
      %22 = vector.multi_reduction <add>, %21, %cst_17 [0] : vector<16x128xf32> to vector<128xf32>
      %23 = vector.shape_cast %22 : vector<128xf32> to vector<1x128xf32>
      %24 = arith.addf %20, %23 : vector<1x128xf32>
      %c0_18 = arith.constant 0 : index
      %c0_19 = arith.constant 0 : index
      %25 = vector.load %arg11[%c0_18, %c0_19] : memref<1x128xf32, #tpu.memory_space<vmem>>, vector<1x128xf32>
      tpu.vector_store %arg11[%c0_18, %c0_19], %24 {strides = array<i32>} : memref<1x128xf32, #tpu.memory_space<vmem>>, vector<1x128xf32>,
    } else {
    }
    %c0_i32_8 = arith.constant 0 : i32
    %12 = arith.cmpi sgt, %arg0, %c0_i32_8 : i32
    %13 = arith.extui %12 : i1 to i32
    %c0_i32_9 = arith.constant 0 : i32
    %14 = arith.cmpi ne, %13, %c0_i32_9 : i32
    scf.if %14 {
      %c0_10 = arith.constant 0 : index
      %c0_11 = arith.constant 0 : index
      %15 = vector.load %arg10[%c0_10, %c0_11] : memref<1x128xf32, #tpu.memory_space<vmem>>, vector<1x128xf32>
      %cst_12 = arith.constant 3.125000e-02 : f32
      %16 = vector.broadcast %cst_12 : f32 to vector<1x128xf32>
      %17 = arith.mulf %15, %16 : vector<1x128xf32>
      %c0_13 = arith.constant 0 : index
      %c0_14 = arith.constant 0 : index
      %18 = vector.load %arg11[%c0_13, %c0_14] : memref<1x128xf32, #tpu.memory_space<vmem>>, vector<1x128xf32>
      %cst_15 = arith.constant 3.125000e-02 : f32
      %19 = vector.broadcast %cst_15 : f32 to vector<1x128xf32>
      %20 = arith.mulf %18, %19 : vector<1x128xf32>
      %21 = arith.mulf %17, %17 : vector<1x128xf32>
      %22 = arith.subf %20, %21 : vector<1x128xf32>
      %c0_16 = arith.constant 0 : index
      %c0_17 = arith.constant 0 : index
      %23 = vector.load %arg5[%c0_16, %c0_17] : memref<1x128xf32, #tpu.memory_space<vmem>>, vector<1x128xf32>
      %cst_18 = arith.constant 9.99999974E-6 : f32
      %24 = vector.broadcast %cst_18 : f32 to vector<1x128xf32>
      %25 = arith.addf %22, %24 : vector<1x128xf32>
      %26 = math.rsqrt %25 : vector<1x128xf32>
      %27 = arith.mulf %23, %26 : vector<1x128xf32>
      %c0_19 = arith.constant 0 : index
      %c0_20 = arith.constant 0 : index
      %28 = vector.load %arg6[%c0_19, %c0_20] : memref<1x128xf32, #tpu.memory_space<vmem>>, vector<1x128xf32>
      %29 = arith.mulf %17, %27 : vector<1x128xf32>
      %30 = arith.subf %28, %29 : vector<1x128xf32>
      %31 = vector.broadcast %27 : vector<1x128xf32> to vector<16x128xf32>
      %32 = arith.mulf %8, %31 : vector<16x128xf32>
      %33 = vector.broadcast %30 : vector<1x128xf32> to vector<16x128xf32>
      %34 = arith.addf %32, %33 : vector<16x128xf32>
      %cst_21 = arith.constant 0.000000e+00 : f32
      %35 = vector.broadcast %cst_21 : f32 to vector<16x128xf32>
      %36 = arith.maximumf %34, %35 : vector<16x128xf32>
      %cst_22 = arith.constant 0.000000e+00 : f32
      %37 = vector.broadcast %cst_22 : f32 to vector<1x128xf32>
      %cst_23 = arith.constant 0.000000e+00 : f32
      %38 = vector.broadcast %cst_23 : f32 to vector<1x128xf32>
      %39 = tpu.concatenate %37, %36, %38 in 0 : vector<1x128xf32>, vector<16x128xf32>, vector<1x128xf32> -> vector<18x128xf32>
      %40 = vector.extract_strided_slice %39 {offsets = [0, 0], sizes = [16, 128], strides = [1, 1]} : vector<18x128xf32> to vector<16x128xf32>
      %41 = vector.extract_strided_slice %39 {offsets = [1, 0], sizes = [16, 128], strides = [1, 1]} : vector<18x128xf32> to vector<16x128xf32>
      %42 = vector.extract_strided_slice %39 {offsets = [2, 0], sizes = [16, 128], strides = [1, 1]} : vector<18x128xf32> to vector<16x128xf32>
      %43 = tpu.concatenate %40, %41, %42 in 1 : vector<16x128xf32>, vector<16x128xf32>, vector<16x128xf32> -> vector<16x384xf32>
      %c0_24 = arith.constant 0 : index
      %c0_25 = arith.constant 0 : index
      %44 = vector.load %arg4[%c0_24, %c0_25] : memref<384x128xf32, #tpu.memory_space<vmem>>, vector<384x128xf32>
      %cst_26 = arith.constant dense<0.000000e+00> : vector<16x128xf32>
      %45 = tpu.matmul %43, %44, %cst_26 {dimension_numbers = #tpu.dot_dimension_numbers<[1], [0], [0], [1], [0, 0, 1, 1], [], []>} : vector<16x384xf32>, vector<384x128xf32>, vector<16x128xf32> -> vector<16x128xf32>
      %c1_i32 = arith.constant 1 : i32
      %46 = arith.cmpi eq, %arg0, %c1_i32 : i32
      %47 = arith.extui %46 : i1 to i32
      %c0_i32_27 = arith.constant 0 : i32
      %48 = arith.cmpi ne, %47, %c0_i32_27 : i32
      scf.if %48 {
        %c0_29 = arith.constant 0 : index
        %c0_30 = arith.constant 0 : index
        %52 = vector.load %arg12[%c0_29, %c0_30] : memref<1x128xf32, #tpu.memory_space<vmem>>, vector<1x128xf32>
        %cst_31 = arith.constant dense<0.000000e+00> : vector<128xf32>
        %53 = vector.multi_reduction <add>, %45, %cst_31 [0] : vector<16x128xf32> to vector<128xf32>
        %54 = vector.shape_cast %53 : vector<128xf32> to vector<1x128xf32>
        %55 = arith.addf %52, %54 : vector<1x128xf32>
        %c0_32 = arith.constant 0 : index
        %c0_33 = arith.constant 0 : index
        %56 = vector.load %arg12[%c0_32, %c0_33] : memref<1x128xf32, #tpu.memory_space<vmem>>, vector<1x128xf32>
        tpu.vector_store %arg12[%c0_32, %c0_33], %55 {strides = array<i32>} : memref<1x128xf32, #tpu.memory_space<vmem>>, vector<1x128xf32>,
        %c0_34 = arith.constant 0 : index
        %c0_35 = arith.constant 0 : index
        %57 = vector.load %arg13[%c0_34, %c0_35] : memref<1x128xf32, #tpu.memory_space<vmem>>, vector<1x128xf32>
        %58 = arith.mulf %45, %45 : vector<16x128xf32>
        %cst_36 = arith.constant dense<0.000000e+00> : vector<128xf32>
        %59 = vector.multi_reduction <add>, %58, %cst_36 [0] : vector<16x128xf32> to vector<128xf32>
        %60 = vector.shape_cast %59 : vector<128xf32> to vector<1x128xf32>
        %61 = arith.addf %57, %60 : vector<1x128xf32>
        %c0_37 = arith.constant 0 : index
        %c0_38 = arith.constant 0 : index
        %62 = vector.load %arg13[%c0_37, %c0_38] : memref<1x128xf32, #tpu.memory_space<vmem>>, vector<1x128xf32>
        tpu.vector_store %arg13[%c0_37, %c0_38], %61 {strides = array<i32>} : memref<1x128xf32, #tpu.memory_space<vmem>>, vector<1x128xf32>,
      } else {
      }
      %c2_i32 = arith.constant 2 : i32
      %49 = arith.cmpi eq, %arg0, %c2_i32 : i32
      %50 = arith.extui %49 : i1 to i32
      %c0_i32_28 = arith.constant 0 : i32
      %51 = arith.cmpi ne, %50, %c0_i32_28 : i32
      scf.if %51 {
        %c0_29 = arith.constant 0 : index
        %c0_30 = arith.constant 0 : index
        %52 = vector.load %arg12[%c0_29, %c0_30] : memref<1x128xf32, #tpu.memory_space<vmem>>, vector<1x128xf32>
        %cst_31 = arith.constant 3.125000e-02 : f32
        %53 = vector.broadcast %cst_31 : f32 to vector<1x128xf32>
        %54 = arith.mulf %52, %53 : vector<1x128xf32>
        %c0_32 = arith.constant 0 : index
        %c0_33 = arith.constant 0 : index
        %55 = vector.load %arg13[%c0_32, %c0_33] : memref<1x128xf32, #tpu.memory_space<vmem>>, vector<1x128xf32>
        %cst_34 = arith.constant 3.125000e-02 : f32
        %56 = vector.broadcast %cst_34 : f32 to vector<1x128xf32>
        %57 = arith.mulf %55, %56 : vector<1x128xf32>
        %58 = arith.mulf %54, %54 : vector<1x128xf32>
        %59 = arith.subf %57, %58 : vector<1x128xf32>
        %c0_35 = arith.constant 0 : index
        %c0_36 = arith.constant 0 : index
        %60 = vector.load %arg7[%c0_35, %c0_36] : memref<1x128xf32, #tpu.memory_space<vmem>>, vector<1x128xf32>
        %cst_37 = arith.constant 9.99999974E-6 : f32
        %61 = vector.broadcast %cst_37 : f32 to vector<1x128xf32>
        %62 = arith.addf %59, %61 : vector<1x128xf32>
        %63 = math.rsqrt %62 : vector<1x128xf32>
        %64 = arith.mulf %60, %63 : vector<1x128xf32>
        %c0_38 = arith.constant 0 : index
        %c0_39 = arith.constant 0 : index
        %65 = vector.load %arg8[%c0_38, %c0_39] : memref<1x128xf32, #tpu.memory_space<vmem>>, vector<1x128xf32>
        %66 = arith.mulf %54, %64 : vector<1x128xf32>
        %67 = arith.subf %65, %66 : vector<1x128xf32>
        %68 = vector.broadcast %64 : vector<1x128xf32> to vector<16x128xf32>
        %69 = arith.mulf %45, %68 : vector<16x128xf32>
        %70 = vector.broadcast %67 : vector<1x128xf32> to vector<16x128xf32>
        %71 = arith.addf %69, %70 : vector<16x128xf32>
        %cst_40 = arith.constant 0.000000e+00 : f32
        %72 = vector.broadcast %cst_40 : f32 to vector<16x128xf32>
        %73 = arith.maximumf %71, %72 : vector<16x128xf32>
        %c0_41 = arith.constant 0 : index
        %c0_42 = arith.constant 0 : index
        %c0_43 = arith.constant 0 : index
        %74 = vector.load %arg9[%c0_41, %c0_42, %c0_43] : memref<1x16x128xf32, #tpu.memory_space<vmem>>, vector<1x16x128xf32>
        %75 = vector.shape_cast %74 : vector<1x16x128xf32> to vector<16x128xf32>
        %76 = vector.shape_cast %73 : vector<16x128xf32> to vector<1x16x128xf32>
        tpu.vector_store %arg9[%c0_41, %c0_42, %c0_43], %76 {strides = array<i32>} : memref<1x16x128xf32, #tpu.memory_space<vmem>>, vector<1x16x128xf32>,
      } else {
      }
    } else {
    }
    return
  }
  func.func @transform_0(%arg0: i32, %arg1: i32) -> (i32, i32, i32) {
    %c0_i32 = arith.constant 0 : i32
    %c0_i32_0 = arith.constant 0 : i32
    %c0_i32_1 = arith.constant 0 : i32
    return %arg1, %c0_i32, %c0_i32_0 : i32, i32, i32
  }
  func.func @transform_1(%arg0: i32, %arg1: i32) -> (i32, i32) {
    %c0_i32 = arith.constant 0 : i32
    %c0_i32_0 = arith.constant 0 : i32
    %c0_i32_1 = arith.constant 0 : i32
    return %c0_i32, %c0_i32_0 : i32, i32
  }
  func.func @transform_2(%arg0: i32, %arg1: i32) -> (i32, i32) {
    %c0_i32 = arith.constant 0 : i32
    %c0_i32_0 = arith.constant 0 : i32
    %c0_i32_1 = arith.constant 0 : i32
    return %c0_i32, %c0_i32_0 : i32, i32
  }
  func.func @transform_3(%arg0: i32, %arg1: i32) -> (i32, i32) {
    %c0_i32 = arith.constant 0 : i32
    %c0_i32_0 = arith.constant 0 : i32
    %c0_i32_1 = arith.constant 0 : i32
    return %c0_i32, %c0_i32_0 : i32, i32
  }
  func.func @transform_4(%arg0: i32, %arg1: i32) -> (i32, i32) {
    %c0_i32 = arith.constant 0 : i32
    %c0_i32_0 = arith.constant 0 : i32
    %c0_i32_1 = arith.constant 0 : i32
    return %c0_i32, %c0_i32_0 : i32, i32
  }
  func.func @transform_5(%arg0: i32, %arg1: i32) -> (i32, i32) {
    %c0_i32 = arith.constant 0 : i32
    %c0_i32_0 = arith.constant 0 : i32
    %c0_i32_1 = arith.constant 0 : i32
    return %c0_i32, %c0_i32_0 : i32, i32
  }
  func.func @transform_6(%arg0: i32, %arg1: i32) -> (i32, i32) {
    %c0_i32 = arith.constant 0 : i32
    %c0_i32_0 = arith.constant 0 : i32
    %c0_i32_1 = arith.constant 0 : i32
    return %c0_i32, %c0_i32_0 : i32, i32
  }
  func.func @transform_7(%arg0: i32, %arg1: i32) -> (i32, i32, i32) {
    %c0_i32 = arith.constant 0 : i32
    %c0_i32_0 = arith.constant 0 : i32
    %c0_i32_1 = arith.constant 0 : i32
    return %arg1, %c0_i32, %c0_i32_0 : i32, i32, i32
  }
}

</mosaic_0001>

<bundles_post_ra>
// kernel: tpu_custom_call.1
= control target key start
LH: loop header
LB: loop body
LE: loop exit
PB: predicated region body
PF: predicated region fallthrough
CT: control target
= control target key end

     0   :  { %s1424_s0 = inlined_call_operand.hbm [shape: f32[2,16,128], index: 0, kind: input, shape index: {}]   ;;  %s1425_s1 = inlined_call_operand.hbm [shape: f32[128,128], index: 1, kind: input, shape index: {}]   ;;  %s1426_s2 = inlined_call_operand.hbm [shape: f32[384,128], index: 2, kind: input, shape index: {}]   ;;  %s1427_s3 = inlined_call_operand.vmem [shape: f32[1,128], index: 3, kind: input, shape index: {}]   ;;  %s1428_s4 = inlined_call_operand.vmem [shape: f32[1,128], index: 4, kind: input, shape index: {}]   ;;  %s1429_s5 = inlined_call_operand.vmem [shape: f32[1,128], index: 5, kind: input, shape index: {}]   ;;  %s1430_s6 = inlined_call_operand.vmem [shape: f32[1,128], index: 6, kind: input, shape index: {}]   ;;  %s1431_s7 = inlined_call_operand.hbm [shape: f32[2,16,128], index: 7, kind: output, shape index: {}]  }
   0x1   :  { %1438 = sst [smem:[#allocation21_spill]] %s1425_s1 }
   0x2   :  { %1439 = sst [smem:[#allocation22_spill]] %s1426_s2 }
   0x3   :  { %12 = vsyncpa [#allocation7], 0 }
   0x4   :  { %14 = vsyncpa [#allocation7 + $0x1], 0 }
   0x5   :  { %15 = vsyncpa [#allocation10], 0 }
   0x6   :  { %16 = vsyncpa [#allocation8], 0 }
   0x7   :  { %18 = vsyncpa [#allocation8 + $0x1], 0  ;;  %s1197_s24 = smov 0   ;;  %s1199_s25 = smov 0  }
   0x8   :  { %s1201_s26 = smov 0   ;;  %s1203_s27 = smov 0  }
   0x9   :  { %s1205_s28 = smov 0   ;;  %s1207_s29 = smov 0  }
   0xa   :  { %s1209_s30 = smov 0   ;;  %s1211_s8 = smov 0  }
   0xb LB: > { %1440 = sst [smem:[#allocation16_spill]] %s1120_s24  ;;  %s789_s9 = sadd.s32 4294967295, %s1148_s8   ;;  %s1148_s8 = sphi %s1211_s8, %s24_s8   ;;  %s1144_s30 = sphi %s1209_s30, %s1460_s30   ;;  %s1140_s29 = sphi %s1207_s29, %s1465_s29   ;;  %s1136_s28 = sphi %s1205_s28, %s1458_s28   ;;  %s1132_s27 = sphi %s1203_s27, %s1464_s27   ;;  %s1128_s26 = sphi %s1201_s26, %s1463_s26   ;;  %s1124_s25 = sphi %s1199_s25, %s1462_s25   ;;  %s1120_s24 = sphi %s1197_s24, %s1461_s24  }
   0xc   : > { %1441 = sst [smem:[#allocation17_spill]] %s1144_s30  ;;  %s790_s10 = sadd.s32 4294967294, %s1148_s8  }
   0xd   : > { %p56_p0 = scmp.ne.s32.totalorder %s1124_s25, %s1120_s24  ;;  %p1243_p1 = scmp.eq.s32.totalorder %s789_s9, 0 }
   0xe   : > { %p212_p2 = scmp.eq.s32.totalorder %s790_s10, 5  ;;  %p791_p4 = scmp.ge.s32.totalorder %s1148_s8, 1 }
   0xf   : > { %p1249_p3 = por %p1243_p1, %p56_p0  ;;  %p219_p6 = scmp.lt.s32.totalorder %s1148_s8, 7 }
  0x10   : > { %p1254_p5 = por %p212_p2, %p56_p0  ;;  %s1446_s1 = sld [smem:[#allocation21_spill]] }
  0x11   : > { %p1262_p7 = pnand %p791_p4, %p219_p6  ;;  %s1150_s18 = smov [#allocation9]  }
  0x12   : > { %s1444_s13 = scalar_select %p1254_p5, 1, 0 }
  0x13   : > { %p860_p8 = pneg %p1262_p7  ;;  %s232_s19 = sshll.u32 %s1150_s18, 4  ;;  %s233_s19 = int_to_ptr.vmem [resolvable:$true] %s232_s19 }
  0x14   : > { %1445 = sst [smem:[#allocation18_spill]] %s1444_s13  ;;  %s1432_s23 = smov 128  }
  0x15   : > { %p861_p9 = pnand %p860_p8, %p1243_p1  ;;  %s1448_s2 = sld [smem:[#allocation22_spill]] }
  0x16   : > { %s230_s16 = sshll.u32 %s1446_s1, 4  ;;  %s1433_s10 = smov 8   ;;  %s231_s16 = int_to_ptr.hbm [resolvable:$true] %s230_s16 }
  0x17   : > { %863 = dma.hbm_to_vmem [thread:$0]  (!%p861_p9), %s231_s16, 2048, %s233_s19, [#allocation10], %s1432_s23, %s1432_s23, %s1433_s10  }
  0x18   : > { %s1153_s14 = smov [#allocation11]   ;;  %p1281_p10 = scmp.eq.s32.totalorder %s789_s9, 5 }
  0x19   : > { %s246_s15 = sshll.u32 %s1153_s14, 4  ;;  %s33_s20 = sadd.s32 1, %s1140_s29  ;;  %s247_s15 = int_to_ptr.vmem [resolvable:$true] %s246_s15 }
  0x1a   : > { %p34_p11 = scmp.ge.s32.totalorder %s33_s20, 2  ;;  %s36_s16 = sadd.s32 1, %s1144_s30 }
  0x1b   : > { %s244_s22 = sshll.u32 %s1448_s2, 4  ;;  %p50_p12 = scmp.ne.s32.totalorder %s1128_s26, %s1124_s25  ;;  %s245_s22 = int_to_ptr.hbm [resolvable:$true] %s244_s22 }
  0x1c   : > { %866 = dma.hbm_to_vmem [thread:$0]  (!%p861_p9), %s245_s22, 6144, %s247_s15, [#allocation10], %s1432_s23, %s1432_s23, %s1433_s10  }
  0x1d   : > { %p51_p13 = scmp.eq.s32.totalorder %s1148_s8, 0  ;;  %s1467_s20 = smov (%p34_p11, %s33_s20), 0 }
  0x1e   : > { %1450 = sst [smem:[#allocation19_spill]] %s1467_s20  ;;  %s1469_s16 = smov (!%p34_p11, %s36_s16), %s1144_s30 }
  0x1f   : > { %s40_s19 = ssub.s32 %s1140_s29, %s1467_s20  ;;  %s43_s21 = sadd.s32 1, %s1128_s26 }
  0x20   : > { %p38_p0 = scmp.ge.s32.totalorder %s1469_s16, 3  ;;  %p41_p2 = scmp.eq.s32.totalorder %s40_s19, 0 }
  0x21   : > { %p1296_p4 = por %p51_p13, %p50_p12  ;;  %p1302_p6 = por %p1281_p10, %p50_p12 }
  0x22   : > { %s1471_s16 = smov (%p38_p0, %s1469_s16), 0  ;;  %s272_s15 = sand.u32 1, %s1128_s26  }
  0x23   : > { %1453 = sst [smem:[#allocation20_spill]] %s1471_s16  ;;  %s814_s23 = sshll.u32 %s1140_s29, 4 }
  0x24   : > { %s1309_s14 = scalar_select %p41_p2, %s1128_s26, %s43_s21  }
  0x25   : > { %p877_p8 = scmp.lt.s32.totalorder %s1148_s8, 6  ;;  %s795_s10 = sshll.u32 %s272_s15, 4 }
  0x26   : > { %s281_s2 = scalar_lea.hbm %s1424_s0, %s814_s23  ;;  %s276_s30 = scalar_lea.vmem [#allocation6], %s795_s10 }
  0x27   : > { %s282_s20 = sshll.u32 %s281_s2, 4  ;;  %s284_s18 = sshll.u32 %s276_s30, 4  ;;  %s283_s20 = int_to_ptr.hbm [resolvable:$true] %s282_s20  ;;  %s285_s18 = int_to_ptr.vmem [resolvable:$true] %s284_s18 }
  0x28   : > { %p868_p9 = pnand %p877_p8, %p1296_p4  ;;  %s273_s13 = scalar_lea.sflag [#allocation7], %s272_s15 }
  0x29   : > { %s1454_s24 = smov 8   ;;  %s1455_s16 = smov 128  }
  0x2a   : > { %870 = dma.hbm_to_vmem [thread:$0]  (!%p868_p9), %s283_s20, 256, %s285_s18, %s273_s13, %s1455_s16, %s1455_s16, %s1454_s24  }
  0x2b   : > { %296 = sbr.rel (%p1262_p7) target bundleno = 527 (0x20f), region = 48  ;;  %s1325_s21 = sand.u32 (!%p1262_p7), 1, %s1124_s25  }
  0x2c   : > { %s799_s1 = sshll.u32 (!%p1262_p7), %s1325_s21, 4  ;;  %s299_s2 = scalar_lea.sflag (!%p1262_p7), [#allocation7], %s1325_s21 }
  0x2d   : > { %s1329_s30 = scalar_lea.vmem (!%p1262_p7), [#allocation6], %s799_s1 }
  0x30   : > { %1107 = dma.done.wait (%p1249_p3), %s299_s2, 256  }
  0x31   : > { %1109 = vsyncadd (%p1249_p3), %s299_s2, 4294967040 }
  0x32   : > { %1111 = dma.done.wait (%p1243_p1), [#allocation10], 8192  }
  0x33   : > { %1113 = vsyncadd (%p1243_p1), [#allocation10], 4294959104  ;;  %p344_p7 = scmp.eq.s32.totalorder %s1136_s28, 0  ;;  %p345_p10 = scmp.eq.s32.totalorder %s1132_s27, 0 }
  0x34   : > { %s1341_s24 = scalar_lea.vmem [#allocation12], %s799_s1 }
  0x35   : > { %p346_p11 = pnand %p345_p10, %p344_p7 }
  0x37   : > { %349 = sbr.rel (%p346_p11) target bundleno = 65 (0x41), region = 64 }
  0x3c   : > { %v1154_v0 = vmov 0.0  }
  0x3d   : > { %350 = vst [vmem:[#allocation2] sm:$0x1] %v1154_v0 }
  0x3e   : > { %351 = vst [vmem:[#allocation3] sm:$0x1] %v1154_v0 }
  0x3f   : > { %352 = vst [vmem:[#allocation4] sm:$0x1] %v1154_v0 }
  0x40   : > { %353 = vst [vmem:[#allocation5] sm:$0x1] %v1154_v0 }
  0x41 PF: > { %v371_v1 = vld [vmem:[#allocation9 + $0x78] sm:$0xff]  ;;  %v370_v2 = vld [vmem:[#allocation9 + $0x70] sm:$0xff]  ;;  %v369_v3 = vld [vmem:[#allocation9 + $0x68] sm:$0xff]  ;;  %p803_p1 = scmp.ne.s32.totalorder %s1136_s28, 0 }
  0x42   : > { %372 = vmatpush.msra.mxu0 %v371_v1  ;;  %816 = vmatpush.msra.mxu1 %v371_v1  ;;  %v368_v4 = vld [vmem:[#allocation9 + $0x60] sm:$0xff]  ;;  %v367_v5 = vld [vmem:[#allocation9 + $0x58] sm:$0xff]  ;;  %v366_v6 = vld [vmem:[#allocation9 + $0x50] sm:$0xff] }
  0x43   : > { %v365_v7 = vld [vmem:[#allocation9 + $0x48] sm:$0xff]  ;;  %v364_v8 = vld [vmem:[#allocation9 + $0x40] sm:$0xff]  ;;  %v363_v9 = vld [vmem:[#allocation9 + $0x38] sm:$0xff] }
  0x44   : > { %373 = vmatpush.msra.mxu0 %v370_v2  ;;  %817 = vmatpush.msra.mxu1 %v370_v2  ;;  %v362_v10 = vld [vmem:[#allocation9 + $0x30] sm:$0xff]  ;;  %v361_v11 = vld [vmem:[#allocation9 + $0x28] sm:$0xff]  ;;  %v360_v12 = vld [vmem:[#allocation9 + $0x20] sm:$0xff] }
  0x45   : > { %v359_v13 = vld [vmem:[#allocation9 + $0x18] sm:$0xff]  ;;  %v358_v14 = vld [vmem:[#allocation9 + $0x10] sm:$0xff]  ;;  %v357_v15 = vld [vmem:[#allocation9 + $0x8] sm:$0xff] }
  0x46   : > { %374 = vmatpush.msra.mxu0 %v369_v3  ;;  %818 = vmatpush.msra.mxu1 %v369_v3  ;;  %v356_v16 = vld [vmem:[#allocation9] sm:$0xff]  ;;  %v355_v18 = vld [vmem:[%s1329_s30 + $0x8] sm:$0xff] }
  0x47   : > { %v354_v17 = vld [vmem:[%s1329_s30] sm:$0xff] }
  0x48   : > { %375 = vmatpush.msra.mxu0 %v368_v4  ;;  %819 = vmatpush.msra.mxu1 %v368_v4 }
  0x4a   : > { %376 = vmatpush.msra.mxu0 %v367_v5  ;;  %820 = vmatpush.msra.mxu1 %v367_v5 }
  0x4c   : > { %377 = vmatpush.msra.mxu0 %v366_v6  ;;  %821 = vmatpush.msra.mxu1 %v366_v6 }
  0x4e   : > { %378 = vmatpush.msra.mxu0 %v365_v7  ;;  %822 = vmatpush.msra.mxu1 %v365_v7 }
  0x50   : > { %379 = vmatpush.msra.mxu0 %v364_v8  ;;  %823 = vmatpush.msra.mxu1 %v364_v8 }
  0x52   : > { %380 = vmatpush.msra.mxu0 %v363_v9  ;;  %824 = vmatpush.msra.mxu1 %v363_v9 }
  0x54   : > { %381 = vmatpush.msra.mxu0 %v362_v10  ;;  %825 = vmatpush.msra.mxu1 %v362_v10 }
  0x56   : > { %382 = vmatpush.msra.mxu0 %v361_v11  ;;  %826 = vmatpush.msra.mxu1 %v361_v11 }
  0x58   : > { %383 = vmatpush.msra.mxu0 %v360_v12  ;;  %827 = vmatpush.msra.mxu1 %v360_v12 }
  0x5a   : > { %384 = vmatpush.msra.mxu0 %v359_v13  ;;  %828 = vmatpush.msra.mxu1 %v359_v13 }
  0x5c   : > { %385 = vmatpush.msra.mxu0 %v358_v14  ;;  %829 = vmatpush.msra.mxu1 %v358_v14 }
  0x5e   : > { %386 = vmatpush.msra.mxu0 %v357_v15  ;;  %830 = vmatpush.msra.mxu1 %v357_v15 }
  0x60   : > { %387 = vmatpush.msra.mxu0 %v356_v16  ;;  %831 = vmatpush.msra.mxu1 %v356_v16 }
  0x61   : > { %388 = vmatmul.f32.vlgmr.msra.gmra.mxu0 %v354_v17  ;;  %391 = vmatmul.f32.vlgmr.msra.gmra.mxu1 %v355_v18 }
  0xda   : > { %397 = sbr.rel (%p803_p1) target bundleno = 242 (0xf2), region = 68 }
  0xde   : > { %v1345_v19 = vpop.f32.mrf.mxu0  ;;  %v1347_v20 = vpop.f32.mrf.mxu1 }
  0xdf   : > { %v399_v21 = vadd.f32 %v1347_v20, %v1345_v19  ;;  %v409_v22 = vmul.f32 %v1345_v19, %v1345_v19  ;;  %v410_v23 = vmul.f32 %v1347_v20, %v1347_v20  ;;  %v398_v34 = vld [vmem:[#allocation2] sm:$0x1]  ;;  %v408_v37 = vld [vmem:[#allocation3] sm:$0x1] }
  0xe1   : > { %v400_v24 = vrot.slane %v399_v21, 4  ;;  %v411_v25 = vadd.f32 %v410_v23, %v409_v22 }
  0xe3   : > { %v401_v26 = vadd.f32 %v400_v24, %v399_v21  ;;  %v412_v27 = vrot.slane %v411_v25, 4 }
  0xe5   : > { %v402_v28 = vrot.slane %v401_v26, 2  ;;  %v413_v29 = vadd.f32 %v412_v27, %v411_v25 }
  0xe7   : > { %v403_v30 = vadd.f32 %v402_v28, %v401_v26  ;;  %v414_v31 = vrot.slane %v413_v29, 2 }
  0xe9   : > { %v404_v32 = vrot.slane %v403_v30, 1  ;;  %v415_v33 = vadd.f32 %v414_v31, %v413_v29 }
  0xeb   : > { %v405_v35 = vadd.f32 %v404_v32, %v403_v30  ;;  %v416_v36 = vrot.slane %v415_v33, 1 }
  0xed   : > { %v406_v38 = vadd.f32 %v405_v35, %v398_v34  ;;  %v417_v39 = vadd.f32 %v416_v36, %v415_v33 }
  0xef   : > { %407 = vst [vmem:[#allocation2] sm:$0x1] %v406_v38  ;;  %v418_v40 = vadd.f32 %v417_v39, %v408_v37 }
  0xf1   : > { %419 = vst [vmem:[#allocation3] sm:$0x1] %v418_v40 }
  0xf2 PF: > { %p804_p3 = scmp.le.s32.totalorder %s1136_s28, 0 }
  0xf3   : > { %p807_p12 = scmp.ne.s32.totalorder (!%p804_p3), %s1136_s28, 1 }
  0xf4   : > { %423 = sbr.rel (%p804_p3) target bundleno = 511 (0x1ff), region = 72 }
  0xf9   : > { %v534_v41 = vld [vmem:[#allocation11 + $0x178] sm:$0xff]  ;;  %v533_v42 = vld [vmem:[#allocation11 + $0x170] sm:$0xff]  ;;  %v532_v46 = vld [vmem:[#allocation11 + $0x168] sm:$0xff]  ;;  %vm460_vm3 = vcmask 1040384   ;;  %vm479_vm5 = vcmask 1045504   ;;  %vm471_vm6 = vcmask 1046528  }
  0xfa   : > { %v502_v43 = vld [vmem:[#allocation11 + $0x78] sm:$0xff]  ;;  %581 = vmatpush.msra.mxu2 %v534_v41  ;;  %v501_v45 = vld [vmem:[#allocation11 + $0x70] sm:$0xff]  ;;  %v500_v48 = vld [vmem:[#allocation11 + $0x68] sm:$0xff] }
  0xfb   : > { %535 = vmatpush.msra.mxu0 %v502_v43  ;;  %v518_v44 = vld [vmem:[#allocation11 + $0xf8] sm:$0xff]  ;;  %832 = vmatpush.msra.mxu3 %v502_v43  ;;  %v517_v47 = vld [vmem:[#allocation11 + $0xf0] sm:$0xff]  ;;  %v516_v49 = vld [vmem:[#allocation11 + $0xe8] sm:$0xff] }
  0xfc   : > { %558 = vmatpush.msra.mxu1 %v518_v44  ;;  %582 = vmatpush.msra.mxu2 %v533_v42  ;;  %v531_v50 = vld [vmem:[#allocation11 + $0x160] sm:$0xff]  ;;  %v530_v53 = vld [vmem:[#allocation11 + $0x158] sm:$0xff]  ;;  %v529_v56 = vld [vmem:[#allocation11 + $0x150] sm:$0xff] }
  0xfd   : > { %536 = vmatpush.msra.mxu0 %v501_v45  ;;  %833 = vmatpush.msra.mxu3 %v501_v45  ;;  %v499_v51 = vld [vmem:[#allocation11 + $0x60] sm:$0xff]  ;;  %v498_v54 = vld [vmem:[#allocation11 + $0x58] sm:$0xff]  ;;  %v497_v57 = vld [vmem:[#allocation11 + $0x50] sm:$0xff] }
  0xfe   : > { %559 = vmatpush.msra.mxu1 %v517_v47  ;;  %583 = vmatpush.msra.mxu2 %v532_v46  ;;  %v515_v52 = vld [vmem:[#allocation11 + $0xe0] sm:$0xff]  ;;  %v514_v55 = vld [vmem:[#allocation11 + $0xd8] sm:$0xff]  ;;  %v513_v58 = vld [vmem:[#allocation11 + $0xd0] sm:$0xff] }
  0xff   : > { %537 = vmatpush.msra.mxu0 %v500_v48  ;;  %834 = vmatpush.msra.mxu3 %v500_v48  ;;  %v528_v59 = vld [vmem:[#allocation11 + $0x148] sm:$0xff]  ;;  %v527_v62 = vld [vmem:[#allocation11 + $0x140] sm:$0xff]  ;;  %v526_v1 = vld [vmem:[#allocation11 + $0x138] sm:$0xff] }
 0x100   : > { %560 = vmatpush.msra.mxu1 %v516_v49  ;;  %584 = vmatpush.msra.mxu2 %v531_v50  ;;  %v496_v60 = vld [vmem:[#allocation11 + $0x48] sm:$0xff]  ;;  %v495_v63 = vld [vmem:[#allocation11 + $0x40] sm:$0xff]  ;;  %v494_v2 = vld [vmem:[#allocation11 + $0x38] sm:$0xff] }
 0x101   : > { %538 = vmatpush.msra.mxu0 %v499_v51  ;;  %835 = vmatpush.msra.mxu3 %v499_v51  ;;  %v512_v61 = vld [vmem:[#allocation11 + $0xc8] sm:$0xff]  ;;  %v511_v0 = vld [vmem:[#allocation11 + $0xc0] sm:$0xff]  ;;  %v424_v3 = vld [vmem:[#allocation2] sm:$0x1] }
 0x102   : > { %561 = vmatpush.msra.mxu1 %v515_v52  ;;  %585 = vmatpush.msra.mxu2 %v530_v53  ;;  %v510_v4 = vld [vmem:[#allocation11 + $0xb8] sm:$0xff]  ;;  %v1357_v5 = vmul.f32 0.03125, %v424_v3  ;;  %v525_v7 = vld [vmem:[#allocation11 + $0x130] sm:$0xff]  ;;  %v524_v12 = vld [vmem:[#allocation11 + $0x128] sm:$0xff] }
 0x103   : > { %539 = vmatpush.msra.mxu0 %v498_v54  ;;  %836 = vmatpush.msra.mxu3 %v498_v54  ;;  %v426_v6 = vld [vmem:[#allocation3] sm:$0x1]  ;;  %v493_v8 = vld [vmem:[#allocation11 + $0x30] sm:$0xff]  ;;  %v492_v13 = vld [vmem:[#allocation11 + $0x28] sm:$0xff] }
 0x104   : > { %562 = vmatpush.msra.mxu1 %v514_v55  ;;  %586 = vmatpush.msra.mxu2 %v529_v56  ;;  %v427_v9 = vmul.f32 0.03125, %v426_v6  ;;  %v509_v10 = vld [vmem:[#allocation11 + $0xb0] sm:$0xff]  ;;  %v428_v11 = vmul.f32 %v1357_v5, %v1357_v5  ;;  %v508_v14 = vld [vmem:[#allocation11 + $0xa8] sm:$0xff]  ;;  %v523_v16 = vld [vmem:[#allocation11 + $0x120] sm:$0xff] }
 0x105   : > { %540 = vmatpush.msra.mxu0 %v497_v57  ;;  %837 = vmatpush.msra.mxu3 %v497_v57  ;;  %v491_v17 = vld [vmem:[#allocation11 + $0x20] sm:$0xff]  ;;  %v522_v22 = vld [vmem:[#allocation11 + $0x118] sm:$0xff]  ;;  %v521_v25 = vld [vmem:[#allocation11 + $0x110] sm:$0xff] }
 0x106   : > { %563 = vmatpush.msra.mxu1 %v513_v58  ;;  %587 = vmatpush.msra.mxu2 %v528_v59  ;;  %v429_v15 = vsub.f32 %v427_v9, %v428_v11  ;;  %v507_v18 = vld [vmem:[#allocation11 + $0xa0] sm:$0xff]  ;;  %v490_v23 = vld [vmem:[#allocation11 + $0x18] sm:$0xff]  ;;  %v489_v26 = vld [vmem:[#allocation11 + $0x10] sm:$0xff] }
 0x107   : > { %541 = vmatpush.msra.mxu0 %v496_v60  ;;  %838 = vmatpush.msra.mxu3 %v496_v60  ;;  %v506_v24 = vld [vmem:[#allocation11 + $0x98] sm:$0xff]  ;;  %v505_v27 = vld [vmem:[#allocation11 + $0x90] sm:$0xff]  ;;  %v520_v28 = vld [vmem:[#allocation11 + $0x108] sm:$0xff] }
 0x108   : > { %564 = vmatpush.msra.mxu1 %v512_v61  ;;  %588 = vmatpush.msra.mxu2 %v527_v62  ;;  %v431_v21 = vadd.f32 1e-05, %v429_v15  ;;  %v488_v29 = vld [vmem:[#allocation11 + $0x8] sm:$0xff]  ;;  %v519_v31 = vld [vmem:[#allocation11 + $0x100] sm:$0xff]  ;;  %v430_v39 = vld [vmem:[%s1427_s3] sm:$0x1] }
 0x109   : > { %542 = vmatpush.msra.mxu0 %v495_v63  ;;  %839 = vmatpush.msra.mxu3 %v495_v63  ;;  %v504_v30 = vld [vmem:[#allocation11 + $0x88] sm:$0xff]  ;;  %v487_v32 = vld [vmem:[#allocation11] sm:$0xff]  ;;  %v443_v43 = vld [vmem:[%s1428_s4] sm:$0x1] }
 0x10a   : > { %565 = vmatpush.msra.mxu1 %v511_v0  ;;  %589 = vmatpush.msra.mxu2 %v526_v1  ;;  %952 = vrsqrt.f32 %v431_v21  ;;  %v503_v34 = vld [vmem:[#allocation11 + $0x80] sm:$0xff]  ;;  %vm438_vm0 = vweird.f32 %v431_v21  ;;  %vm805_vm4 = vmneg %vm460_vm3 }
 0x10b   : > { %543 = vmatpush.msra.mxu0 %v494_v2  ;;  %840 = vmatpush.msra.mxu3 %v494_v2 }
 0x10c   : > { %566 = vmatpush.msra.mxu1 %v510_v4  ;;  %590 = vmatpush.msra.mxu2 %v525_v7 }
 0x10d   : > { %544 = vmatpush.msra.mxu0 %v493_v8  ;;  %841 = vmatpush.msra.mxu3 %v493_v8 }
 0x10e   : > { %567 = vmatpush.msra.mxu1 %v509_v10  ;;  %591 = vmatpush.msra.mxu2 %v524_v12 }
 0x10f   : > { %545 = vmatpush.msra.mxu0 %v492_v13  ;;  %842 = vmatpush.msra.mxu3 %v492_v13 }
 0x110   : > { %568 = vmatpush.msra.mxu1 %v508_v14  ;;  %592 = vmatpush.msra.mxu2 %v523_v16  ;;  %v953_v33 = vpop.eup %952 }
 0x111   : > { %546 = vmatpush.msra.mxu0 %v491_v17  ;;  %843 = vmatpush.msra.mxu3 %v491_v17  ;;  %v433_v35 = vmul.f32 %v953_v33, %v431_v21  ;;  %vm439_vm1 = vweird.f32 %v953_v33 }
 0x112   : > { %569 = vmatpush.msra.mxu1 %v507_v18  ;;  %593 = vmatpush.msra.mxu2 %v522_v22  ;;  %vm440_vm2 = vmor %vm438_vm0, %vm439_vm1 }
 0x113   : > { %547 = vmatpush.msra.mxu0 %v490_v23  ;;  %844 = vmatpush.msra.mxu3 %v490_v23  ;;  %v434_v36 = vmul.f32 %v953_v33, %v433_v35 }
 0x114   : > { %570 = vmatpush.msra.mxu1 %v506_v24  ;;  %594 = vmatpush.msra.mxu2 %v521_v25 }
 0x115   : > { %548 = vmatpush.msra.mxu0 %v489_v26  ;;  %845 = vmatpush.msra.mxu3 %v489_v26  ;;  %v435_v37 = vmul.f32 0.5, %v434_v36 }
 0x116   : > { %571 = vmatpush.msra.mxu1 %v505_v27  ;;  %595 = vmatpush.msra.mxu2 %v520_v28 }
 0x117   : > { %549 = vmatpush.msra.mxu0 %v488_v29  ;;  %846 = vmatpush.msra.mxu3 %v488_v29  ;;  %v436_v38 = vsub.f32 1.5, %v435_v37 }
 0x118   : > { %572 = vmatpush.msra.mxu1 %v504_v30  ;;  %596 = vmatpush.msra.mxu2 %v519_v31 }
 0x119   : > { %550 = vmatpush.msra.mxu0 %v487_v32  ;;  %847 = vmatpush.msra.mxu3 %v487_v32  ;;  %v437_v40 = vmul.f32 %v953_v33, %v436_v38 }
 0x11a   : > { %573 = vmatpush.msra.mxu1 %v503_v34 }
 0x11b   : > { %v441_v41 = vsel %vm440_vm2, %v953_v33, %v437_v40 }
 0x11c   : > { %v442_v42 = vmul.f32 %v441_v41, %v430_v39 }
 0x11e   : > { %v444_v44 = vmul.f32 %v442_v42, %v1357_v5  ;;  %v447_v45 = vperm.slane %v442_v42, 0 }
 0x120   : > { %v445_v46 = vsub.f32 %v443_v43, %v444_v44  ;;  %v449_v47 = vmul.f32 %v447_v45, %v1345_v19  ;;  %v450_v48 = vmul.f32 %v447_v45, %v1347_v20 }
 0x122   : > { %v452_v49 = vperm.slane %v445_v46, 0 }
 0x124   : > { %v454_v50 = vadd.f32 %v452_v49, %v449_v47  ;;  %v455_v51 = vadd.f32 %v452_v49, %v450_v48 }
 0x126   : > { %v456_v52 = vmax.f32 %v454_v50, 0.0  ;;  %v457_v53 = vmax.f32 %v455_v51, 0.0 }
 0x128   : > { %v461_v54 = vrot.slane %v456_v52, 7  ;;  %v462_v55 = vrot.slane %v457_v53, 7 }
 0x12a   : > { %v463_v56 = vsel %vm460_vm3, %v461_v54, %v462_v55  ;;  %v467_v57 = vsel %vm460_vm3, 0.0, %v461_v54  ;;  %806 = vmatmul.msk.f32.vlgmr.msra.gmra.mxu0 %vm805_vm4, %v461_v54  ;;  %v468_v20 = vsel %vm460_vm3, %v462_v55, 0.0 }
 0x12b   : > { %v480_v58 = vrot.slane %v467_v57, 2  ;;  %v481_v59 = vrot.slane %v463_v56, 2  ;;  %v472_v60 = vrot.slane %v467_v57, 1  ;;  %v473_v19 = vrot.slane %v463_v56, 1  ;;  %554 = vmatmul.f32.vlgmr.msra.gmra.mxu3 %v463_v56 }
 0x12c   : > { %v483_v63 = vrot.slane %v468_v20, 2  ;;  %v475_v0 = vrot.slane %v468_v20, 1 }
 0x12d   : > { %v482_v61 = vsel %vm479_vm5, %v480_v58, %v481_v59  ;;  %v474_v62 = vsel %vm471_vm6, %v472_v60, %v473_v19 }
 0x12e   : > { %597 = vmatmul.f32.vlgmr.msra.gmra.mxu2 %v482_v61  ;;  %574 = vmatmul.f32.vlgmr.msra.gmra.mxu1 %v474_v62  ;;  %v484_v1 = vsel %vm479_vm5, %v481_v59, %v483_v63  ;;  %v476_v2 = vsel %vm471_vm6, %v473_v19, %v475_v0 }
 0x136   : > { %600 = vmatmul.f32.gmra.mxu2 %v484_v1  ;;  %577 = vmatmul.f32.gmra.mxu1 %v476_v2 }
 0x1a7   : > { %v552_v3 = vpop.f32.mrf.mxu0 }
 0x1ab   : > { %v575_v4 = vpop.f32.mrf.mxu1 }
 0x1ac   : > { %v576_v5 = vadd.f32 %v575_v4, %v552_v3 }
 0x1ae   : > { %v555_v8 = vpop.f32.mrf.mxu3 }
 0x1b1   : > { %v598_v6 = vpop.f32.mrf.mxu2 }
 0x1b2   : > { %v599_v7 = vadd.f32 %v598_v6, %v576_v5 }
 0x1b3   : > { %v578_v9 = vpop.f32.mrf.mxu1 }
 0x1b4   : > { %v579_v10 = vadd.f32 %v578_v9, %v555_v8 }
 0x1b6   : > { %607 = sbr.rel (%p807_p12) target bundleno = 463 (0x1cf), region = 76 }
 0x1b9   : > { %v601_v11 = vpop.f32.mrf.mxu2 }
 0x1ba   : > { %v602_v12 = vadd.f32 %v601_v11, %v579_v10 }
 0x1bb   : > { %v619_v14 = vmul.f32 %v599_v7, %v599_v7  ;;  %v608_v28 = vld [vmem:[#allocation4] sm:$0x1]  ;;  %v618_v31 = vld [vmem:[#allocation5] sm:$0x1] }
 0x1bc   : > { %v609_v13 = vadd.f32 %v602_v12, %v599_v7  ;;  %v620_v15 = vmul.f32 %v602_v12, %v602_v12 }
 0x1be   : > { %v610_v16 = vrot.slane %v609_v13, 4  ;;  %v621_v17 = vadd.f32 %v620_v15, %v619_v14 }
 0x1c0   : > { %v611_v18 = vadd.f32 %v610_v16, %v609_v13  ;;  %v622_v21 = vrot.slane %v621_v17, 4 }
 0x1c2   : > { %v612_v22 = vrot.slane %v611_v18, 2  ;;  %v623_v23 = vadd.f32 %v622_v21, %v621_v17 }
 0x1c4   : > { %v613_v24 = vadd.f32 %v612_v22, %v611_v18  ;;  %v624_v25 = vrot.slane %v623_v23, 2 }
 0x1c6   : > { %v614_v26 = vrot.slane %v613_v24, 1  ;;  %v625_v27 = vadd.f32 %v624_v25, %v623_v23 }
 0x1c8   : > { %v615_v29 = vadd.f32 %v614_v26, %v613_v24  ;;  %v626_v30 = vrot.slane %v625_v27, 1 }
 0x1ca   : > { %v616_v32 = vadd.f32 %v615_v29, %v608_v28  ;;  %v627_v33 = vadd.f32 %v626_v30, %v625_v27 }
 0x1cc   : > { %617 = vst [vmem:[#allocation4] sm:$0x1] %v616_v32  ;;  %v628_v34 = vadd.f32 %v627_v33, %v618_v31 }
 0x1ce   : > { %629 = vst [vmem:[#allocation5] sm:$0x1] %v628_v34 }
 0x1cf PF: > { %p808_p13 = scmp.ne.s32.totalorder %s1136_s28, 2 }
 0x1d1   : > { %633 = sbr.rel (%p808_p13) target bundleno = 511 (0x1ff), region = 80 }
 0x1d6   : > { %v634_v35 = vld [vmem:[#allocation4] sm:$0x1]  ;;  %v636_v36 = vld [vmem:[#allocation5] sm:$0x1]  ;;  %v640_v47 = vld [vmem:[%s1429_s5] sm:$0x1] }
 0x1d7   : > { %v635_v37 = vmul.f32 0.03125, %v634_v35  ;;  %v637_v38 = vmul.f32 0.03125, %v636_v36  ;;  %v653_v51 = vld [vmem:[%s1430_s6] sm:$0x1] }
 0x1d9   : > { %v638_v39 = vmul.f32 %v635_v37, %v635_v37 }
 0x1db   : > { %v639_v40 = vsub.f32 %v637_v38, %v638_v39 }
 0x1dd   : > { %v641_v41 = vadd.f32 1e-05, %v639_v40 }
 0x1df   : > { %954 = vrsqrt.f32 %v641_v41  ;;  %vm648_vm7 = vweird.f32 %v641_v41 }
 0x1e5   : > { %v955_v42 = vpop.eup %954 }
 0x1e6   : > { %v643_v43 = vmul.f32 %v955_v42, %v641_v41  ;;  %vm649_vm8 = vweird.f32 %v955_v42 }
 0x1e7   : > { %vm650_vm9 = vmor %vm648_vm7, %vm649_vm8 }
 0x1e8   : > { %v644_v44 = vmul.f32 %v955_v42, %v643_v43 }
 0x1ea   : > { %v645_v45 = vmul.f32 0.5, %v644_v44 }
 0x1ec   : > { %v646_v46 = vsub.f32 1.5, %v645_v45 }
 0x1ee   : > { %v647_v48 = vmul.f32 %v955_v42, %v646_v46 }
 0x1f0   : > { %v651_v49 = vsel %vm650_vm9, %v955_v42, %v647_v48 }
 0x1f1   : > { %v652_v50 = vmul.f32 %v651_v49, %v640_v47 }
 0x1f3   : > { %v654_v52 = vmul.f32 %v652_v50, %v635_v37  ;;  %v657_v53 = vperm.slane %v652_v50, 0 }
 0x1f5   : > { %v655_v54 = vsub.f32 %v653_v51, %v654_v52  ;;  %v659_v55 = vmul.f32 %v657_v53, %v599_v7  ;;  %v660_v56 = vmul.f32 %v657_v53, %v602_v12 }
 0x1f7   : > { %v662_v57 = vperm.slane %v655_v54, 0 }
 0x1f9   : > { %v664_v58 = vadd.f32 %v662_v57, %v659_v55  ;;  %v665_v59 = vadd.f32 %v662_v57, %v660_v56 }
 0x1fb   : > { %v666_v60 = vmax.f32 %v664_v58, 0.0  ;;  %v667_v19 = vmax.f32 %v665_v59, 0.0 }
 0x1fd   : > { %668 = vst [vmem:[%s1341_s24] sm:$0xff] %v666_v60 }
 0x1fe   : > { %669 = vst [vmem:[%s1341_s24 + $0x8] sm:$0xff] %v667_v19 }
 0x1ff PF: > { %s815_s16 = sshll.u32 %s1132_s27, 4  ;;  %s683_s18 = sshll.u32 %s1341_s24, 4  ;;  %s684_s18 = int_to_ptr.vmem [resolvable:$true] %s683_s18 }
 0x200   : > { %s682_s19 = scalar_lea.hbm %s1431_s7, %s815_s16  ;;  %s671_s2 = scalar_lea.sflag [#allocation8], %s1325_s21 }
 0x201   : > { %s685_s1 = sshll.u32 %s682_s19, 4  ;;  %s1066_s27 = scalar_lea.hbm %s1431_s7, 32  ;;  %s686_s1 = int_to_ptr.hbm [resolvable:$true] %s685_s1 }
 0x202   : > { %s1060_s30 = sshra.s32 %s686_s1, 4  ;;  %s1061_s30 = int_to_ptr.hbm [resolvable:$true] %s1060_s30 }
 0x203   : > { %s1062_s11 = scalar_lea.hbm %s1061_s30, 16  ;;  %p1067_p8 = scmp.lt.s32.totalorder %s1061_s30, %s1431_s7 }
 0x204   : > { %p1063_p0 = scmp.ne.s32.totalorder %s1061_s30, %s1062_s11  ;;  %p1068_p9 = scmp.lt.s32.totalorder %s1066_s27, %s1062_s11 }
 0x206   : > { %p1064_p2 = pnand %p1063_p0, %p1302_p6  ;;  %p1069_p7 = por %p1068_p9, %p1067_p8 }
 0x208   : > { %p1065_p4 = pneg %p1064_p2 }
 0x20a   : > { %p1070_p10 = pnand %p1069_p7, %p1065_p4 }
 0x20c   : > { %1073 = shalt.err (!%p1070_p10)
}
 0x20d   : > { %s1155_s21 = smov 128   ;;  %s1156_s24 = smov 8  }
 0x20e   : > { %858 = dma.vmem_to_hbm [thread:$0]  (%p1302_p6), %s684_s18, 256, %s686_s1, %s671_s2, %s1155_s21, %s1155_s21, %s1156_s24  }
 0x20f PF: > { %s1456_s10 = sld [smem:[#allocation16_spill]]  ;;  %p880_p11 = scmp.ge.s32.totalorder %s1148_s8, 2 }
 0x211   : > { %p872_p1 = pnand %p880_p11, %p1254_p5 }
 0x213   : > { %p873_p3 = pneg %p872_p1 }
 0x215   : > { %s700_s20 = sand.u32 1, %s1456_s10  }
 0x216   : > { %s701_s16 = scalar_lea.sflag [#allocation8], %s700_s20 }
 0x217   : > { %1115 = dma.done.wait (%p873_p3), %s701_s16, 256  }
 0x218   : > { %1117 = vsyncadd (%p873_p3), %s701_s16, 4294967040  ;;  %s24_s8 = sadd.s32 1, %s1148_s8   ;;  %s1458_s28 = sld [smem:[#allocation17_spill]] }
 0x219   : > { %p21_p12 = scmp.ge.s32.totalorder %s24_s8, 8   ;;  %s1459_s22 = sld [smem:[#allocation19_spill]] }
 0x21a   : > { %s1460_s30 = sld [smem:[#allocation20_spill]]  ;;  %s1461_s24 = smov %s1124_s25 }
 0x21b   : > { %s1462_s25 = smov %s1128_s26  ;;  %s1463_s26 = smov %s1309_s14 }
 0x21c   : > { %s1464_s27 = smov %s1140_s29  ;;  %23 = sbr.rel (!%p21_p12) target bundleno = 11 (0xb), region = 121 }
 0x21f   : > { %s1465_s29 = smov %s1459_s22 }
 0x221   :  { %707 = vsyncpa [#allocation7], 1 }
 0x222   :  { %709 = vsyncpa [#allocation7 + $0x1], 1 }
 0x223   :  { %710 = vsyncpa [#allocation10], 1 }
 0x224   :  { %711 = vsyncpa [#allocation8], 1 }
 0x225   :  { %713 = vsyncpa [#allocation8 + $0x1], 1 }

</bundles_post_ra>
